<compile_context>
chip_gen: v5e
topology: v5e:2x2
jax: 0.10.0
libtpu: 0.0.40
codegen_flags: <defaults>
</compile_context>

<pallas_src>
import functools

import jax
import jax.numpy as jnp
from jax import lax
from jax.experimental import pallas as pl
from jax.experimental.pallas import tpu as pltpu


def _round_up(x, m):
    return ((x + m - 1) // m) * m


# ----------------------------------------------------------------------------
# Pallas kernel
# ----------------------------------------------------------------------------
def _preact_bottleneck_kernel(H, W, b_blk, p_pad,
                              x_ref,      # (Cin_pad, L)   L = b_blk * H * W
                              bn1s_ref,   # (Cin_pad, 1)
                              bn1b_ref,   # (Cin_pad, 1)   padding row Cin -> 1.0 (bias row)
                              wf_ref,     # (P_pad + Cout_pad, Cin_pad) fused conv1(+bn2) & shortcut
                              wm_ref,     # (9, P_pad, L)  depthwise conv2 weights*mask*bn3_scale
                              bn3b_ref,   # (P_pad, 1)
                              w3_ref,     # (Cout_pad, P_pad)
                              o_ref):     # (Cout_pad, L)
    L = b_blk * H * W
    x = x_ref[...]

    # BN1 (inference affine) + ReLU.  The padded bias row becomes relu(1) = 1.
    t = jnp.maximum(x * bn1s_ref[...] + bn1b_ref[...], 0.0)

    # Fused [conv1 (bn2 scale+shift folded) ; shortcut 1x1] — one MXU matmul.
    fused = jnp.dot(wf_ref[...], t.astype(wf_ref.dtype),
                    preferred_element_type=jnp.float32)      # (P_pad+Cout_pad, L)
    u = jnp.maximum(fused[:p_pad, :], 0.0)                   # conv1 + bn2 + ReLU
    shortcut = fused[p_pad:, :]                              # (Cout_pad, L)

    # conv2: true-depthwise 3x3, stride 1, pad 1 — VPU weighted sum of 9
    # lane-rotated copies of u.  Boundary (and cross-image) taps are zeroed by
    # the mask baked into wm; bn3 scale is folded into wm as well.
    v = u * wm_ref[4]                                        # center tap (d = 0)
    for k in range(9):
        if k == 4:
            continue
        d = (k // 3 - 1) * W + (k % 3 - 1)
        v = v + pltpu.roll(u, (-d) % L, 1) * wm_ref[k]       # out[s] = u[s + d]
    vr = jnp.maximum(v + bn3b_ref[...], 0.0)                 # bn3 shift + ReLU

    # conv3 (grouped 1x1 expanded dense) + residual.
    out = jnp.dot(w3_ref[...], vr.astype(w3_ref.dtype),
                  preferred_element_type=jnp.float32) + shortcut
    o_ref[...] = out.astype(o_ref.dtype)


# ----------------------------------------------------------------------------
# Wrapper
# ----------------------------------------------------------------------------
def preact_bottleneck_depthwise(x_nchw, params):
    """x_nchw: (N, Cin, H, W) float32 -> (N, Cout, H, W) float32."""
    N, Cin, H, W = x_nchw.shape
    S = H * W
    b_blk = params["b_blk"]
    Cout = params["cout"]
    cin_pad = params["bn1_scale"].shape[0]
    p_pad = params["bn3_shift"].shape[0]
    cout_pad = params["w3"].shape[0]
    assert N % b_blk == 0, "batch must be divisible by the packing factor"
    G = N // b_blk
    L = b_blk * S

    # Pack batch into the lane axis: x_packed[c, n*S + s] = x[n, c, s].
    xp = x_nchw.reshape(N, Cin, S).transpose(1, 0, 2).reshape(Cin, N * S)
    xp = jnp.pad(xp, ((0, cin_pad - Cin), (0, 0)))

    kernel = functools.partial(_preact_bottleneck_kernel, H, W, b_blk, p_pad)

    grid_spec = pltpu.PrefetchScalarGridSpec(
        num_scalar_prefetch=0,
        grid=(G,),
        in_specs=[
            pl.BlockSpec((cin_pad, L), lambda g: (0, g)),              # x tile
            pl.BlockSpec((cin_pad, 1), lambda g: (0, 0)),              # bn1 scale
            pl.BlockSpec((cin_pad, 1), lambda g: (0, 0)),              # bn1 shift (+bias row)
            pl.BlockSpec((p_pad + cout_pad, cin_pad), lambda g: (0, 0)),  # fused conv1+shortcut
            pl.BlockSpec((9, p_pad, L), lambda g: (0, 0, 0)),          # conv2 weighted masks
            pl.BlockSpec((p_pad, 1), lambda g: (0, 0)),                # bn3 shift
            pl.BlockSpec((cout_pad, p_pad), lambda g: (0, 0)),         # conv3
        ],
        out_specs=pl.BlockSpec((cout_pad, L), lambda g: (0, g)),
    )

    out = pl.pallas_call(
        kernel,
        out_shape=jax.ShapeDtypeStruct((cout_pad, N * S), jnp.float32),
        grid_spec=grid_spec,
        compiler_params=pltpu.CompilerParams(
            dimension_semantics=("parallel",)),
    )(xp, params["bn1_scale"], params["bn1_shift"], params["w_fused"],
      params["wm_conv2"], params["bn3_shift"], params["w3"])

    # Unpack: (Cout_pad, N*S) -> (N, Cout, H, W).
    out = out[:Cout].reshape(Cout, N, S).transpose(1, 0, 2)
    return out.reshape(N, Cout, H, W)


# ----------------------------------------------------------------------------
# Parameter glue (grouped -> dense, BN folding, fusion, padding, tap masks)
# ----------------------------------------------------------------------------
def _expand_grouped_1x1(w, groups):
    """w: (C_out, C_in//groups, 1, 1) -> dense (C_out, C_in) with zero blocks."""
    c_out, cin_g = w.shape[0], w.shape[1]
    c_in = cin_g * groups
    cout_g = c_out // groups
    dense = jnp.zeros((c_out, c_in), jnp.float32)
    for g in range(groups):
        blk = w[g * cout_g:(g + 1) * cout_g, :, 0, 0]
        dense = dense.at[g * cout_g:(g + 1) * cout_g,
                         g * cin_g:(g + 1) * cin_g].set(blk)
    return dense


def _build_taps_mask(H, W):
    """(9, H*W) float mask: 1 where the shifted tap stays inside the image."""
    ys = jnp.arange(H)[:, None]
    xs = jnp.arange(W)[None, :]
    masks = []
    for k in range(9):
        dy, dx = k // 3 - 1, k % 3 - 1
        valid = ((ys + dy >= 0) & (ys + dy < H) &
                 (xs + dx >= 0) & (xs + dx < W))
        masks.append(valid.reshape(-1))
    return jnp.stack(masks, axis=0).astype(jnp.float32)


def make_kernel_params(raw, *, in_planes, planes, expansion, groups, H, W,
                       b_blk, matmul_dtype=jnp.float32):
    """Fold BN, expand grouped convs, fuse conv1+shortcut, pad to sublane tiles."""
    Cin, P, Cout = in_planes, planes, expansion * planes
    S = H * W
    cin_pad = _round_up(Cin + 1, 8)       # +1: reserve a bias row for bn2 shift
    p_pad = _round_up(P, 8)
    cout_pad = _round_up(Cout, 8)

    # BN1 affine, padded; padding row Cin carries the matmul bias (== 1.0).
    bn1s = jnp.zeros((cin_pad, 1), jnp.float32).at[:Cin, 0].set(raw["bn1_scale"])
    bn1b = jnp.zeros((cin_pad, 1), jnp.float32).at[:Cin, 0].set(raw["bn1_shift"])
    bn1b = bn1b.at[Cin, 0].set(1.0)

    # Fused [conv1 (bn2 scale folded, bn2 shift as bias column) ; shortcut 1x1].
    w1_dense = _expand_grouped_1x1(raw["w1"], groups)          # (P, Cin)
    wsc_dense = _expand_grouped_1x1(raw["wsc"], groups)        # (Cout, Cin)
    wf = jnp.zeros((p_pad + cout_pad, cin_pad), jnp.float32)
    wf = wf.at[:P, :Cin].set(raw["bn2_scale"][:, None] * w1_dense)
    wf = wf.at[:P, Cin].set(raw["bn2_shift"])                  # bias column
    wf = wf.at[p_pad:p_pad + Cout, :Cin].set(wsc_dense)

    # conv2: true depthwise (cin/group == 1) -> per-tap weighted masks on VPU.
    assert raw["w2"].shape[1] == 1, "VPU depthwise path requires cin/group == 1"
    mask = jnp.tile(_build_taps_mask(H, W), (1, b_blk))        # (9, b_blk*S)
    wm = jnp.zeros((9, p_pad, b_blk * S), jnp.float32)
    for k in range(9):
        dy, dx = k // 3, k % 3
        wcol = raw["bn3_scale"] * raw["w2"][:, 0, dy, dx]      # (P,)
        wm = wm.at[k, :P, :].set(wcol[:, None] * mask[k][None, :])

    bn3b = jnp.zeros((p_pad, 1), jnp.float32).at[:P, 0].set(raw["bn3_shift"])

    # conv3 (grouped 1x1 expanded dense), padded.
    w3_dense = _expand_grouped_1x1(raw["w3"], groups)          # (Cout, P)
    w3p = jnp.zeros((cout_pad, p_pad), jnp.float32).at[:Cout, :P].set(w3_dense)

    return dict(
        b_blk=b_blk, cout=Cout,
        bn1_scale=bn1s, bn1_shift=bn1b,
        w_fused=wf.astype(matmul_dtype),
        wm_conv2=wm,
        bn3_shift=bn3b,
        w3=w3p.astype(matmul_dtype),
    )


def _bn_inference_params(key, c, eps=1e-5):
    k1, k2, k3, k4 = jax.random.split(key, 4)
    gamma = 1.0 + 0.1 * jax.random.normal(k1, (c,), jnp.float32)
    beta = 0.1 * jax.random.normal(k2, (c,), jnp.float32)
    mean = 0.1 * jax.random.normal(k3, (c,), jnp.float32)
    var = jnp.abs(jax.random.normal(k4, (c,), jnp.float32)) + 0.5
    scale = gamma / jnp.sqrt(var + eps)
    shift = beta - mean * scale
    return scale, shift


# ----------------------------------------------------------------------------
# Pure-JAX reference (mirrors the PyTorch forward, NCHW, grouped convs)
# ----------------------------------------------------------------------------
def _reference_forward(x, raw, groups):
    def bn(z, s, b):
        return z * s[None, :, None, None] + b[None, :, None, None]

    def gconv(z, w, pad):
        return lax.conv_general_dilated(
            z, w, window_strides=(1, 1), padding=((pad, pad), (pad, pad)),
            feature_group_count=groups)

    t = jnp.maximum(bn(x, raw["bn1_scale"], raw["bn1_shift"]), 0.0)
    shortcut = gconv(t, raw["wsc"], 0)
    u = gconv(t, raw["w1"], 0)
    u = jnp.maximum(bn(u, raw["bn2_scale"], raw["bn2_shift"]), 0.0)
    u = gconv(u, raw["w2"], 1)
    u = jnp.maximum(bn(u, raw["bn3_scale"], raw["bn3_shift"]), 0.0)
    u = gconv(u, raw["w3"], 0)
    return u + shortcut


# ----------------------------------------------------------------------------
if __name__ == "__main__":
    # Module config: in_planes=4, planes=4, stride=1, expansion=4.
    in_planes, planes, stride, expansion = 4, 4, 1, 4
    groups = in_planes if in_planes < planes else planes      # = 4
    cout = expansion * planes                                  # = 16 -> conv shortcut
    N, H, W = 4, 16, 16
    B_BLK = 2                                                  # 2 images / grid step -> grid=(2,)

    key = jax.random.PRNGKey(0)
    ks = jax.random.split(key, 9)

    # Raw parameters with exact nn.Conv2d grouped-weight shapes.
    w1 = 0.3 * jax.random.normal(ks[0], (planes, in_planes // groups, 1, 1), jnp.float32)
    w2 = 0.3 * jax.random.normal(ks[1], (planes, planes // groups, 3, 3), jnp.float32)
    w3 = 0.3 * jax.random.normal(ks[2], (cout, planes // groups, 1, 1), jnp.float32)
    wsc = 0.3 * jax.random.normal(ks[3], (cout, in_planes // groups, 1, 1), jnp.float32)
    bn1_scale, bn1_shift = _bn_inference_params(ks[4], in_planes)
    bn2_scale, bn2_shift = _bn_inference_params(ks[5], planes)
    bn3_scale, bn3_shift = _bn_inference_params(ks[6], planes)

    raw = dict(w1=w1, w2=w2, w3=w3, wsc=wsc,
               bn1_scale=bn1_scale, bn1_shift=bn1_shift,
               bn2_scale=bn2_scale, bn2_shift=bn2_shift,
               bn3_scale=bn3_scale, bn3_shift=bn3_shift)

    # matmul_dtype=jnp.bfloat16 is recommended for v6e/v7x at production channel
    # widths; kept f32 here (tiny K, tight tolerance vs. the f32 reference).
    params = make_kernel_params(raw, in_planes=in_planes, planes=planes,
                                expansion=expansion, groups=groups,
                                H=H, W=W, b_blk=B_BLK,
                                matmul_dtype=jnp.float32)

    x = jax.random.normal(ks[7], (N, in_planes, H, W), jnp.float32)

    out = preact_bottleneck_depthwise(x, params)
    out = jax.block_until_ready(out)

    ref = _reference_forward(x, raw, groups)
    if not bool(jnp.allclose(out, ref, atol=2e-3, rtol=2e-3)):
        raise AssertionError("Pallas kernel does not match JAX reference")

    print("KERNEL_OK")
</pallas_src>

<mosaic_0001>
module attributes {stable_mosaic.version = 11 : i64} {
  func.func @_preact_bottleneck_kernel(%arg0: i32, %arg1: memref<8x512xf32, #tpu.memory_space<vmem>>, %arg2: memref<8x1xf32, #tpu.memory_space<vmem>>, %arg3: memref<8x1xf32, #tpu.memory_space<vmem>>, %arg4: memref<24x8xf32, #tpu.memory_space<vmem>>, %arg5: memref<9x8x512xf32, #tpu.memory_space<vmem>>, %arg6: memref<8x1xf32, #tpu.memory_space<vmem>>, %arg7: memref<16x8xf32, #tpu.memory_space<vmem>>, %arg8: memref<16x512xf32, #tpu.memory_space<vmem>>) attributes {dimension_semantics = [#tpu.dimension_semantics<parallel>], iteration_bounds = array<i64: 2>, scalar_prefetch = 0 : i64, scratch_operands = 0 : i64, tpu.core_type = #tpu.core_type<tc>, window_params = [{transform_indices = @transform_0, window_bounds = array<i64: 8, 512>}, {pipeline_mode = #tpu.pipeline_mode<synchronous>, transform_indices = @transform_1, window_bounds = array<i64: 8, 1>}, {pipeline_mode = #tpu.pipeline_mode<synchronous>, transform_indices = @transform_2, window_bounds = array<i64: 8, 1>}, {pipeline_mode = #tpu.pipeline_mode<synchronous>, transform_indices = @transform_3, window_bounds = array<i64: 24, 8>}, {pipeline_mode = #tpu.pipeline_mode<synchronous>, transform_indices = @transform_4, window_bounds = array<i64: 9, 8, 512>}, {pipeline_mode = #tpu.pipeline_mode<synchronous>, transform_indices = @transform_5, window_bounds = array<i64: 8, 1>}, {pipeline_mode = #tpu.pipeline_mode<synchronous>, transform_indices = @transform_6, window_bounds = array<i64: 16, 8>}, {transform_indices = @transform_7, window_bounds = array<i64: 16, 512>}]} {
    %c0 = arith.constant 0 : index
    %c0_0 = arith.constant 0 : index
    %0 = vector.load %arg1[%c0, %c0_0] : memref<8x512xf32, #tpu.memory_space<vmem>>, vector<8x512xf32>
    %c0_1 = arith.constant 0 : index
    %c0_2 = arith.constant 0 : index
    %1 = vector.load %arg2[%c0_1, %c0_2] : memref<8x1xf32, #tpu.memory_space<vmem>>, vector<8x1xf32>
    %2 = vector.broadcast %1 : vector<8x1xf32> to vector<8x512xf32>
    %3 = arith.mulf %0, %2 : vector<8x512xf32>
    %c0_3 = arith.constant 0 : index
    %c0_4 = arith.constant 0 : index
    %4 = vector.load %arg3[%c0_3, %c0_4] : memref<8x1xf32, #tpu.memory_space<vmem>>, vector<8x1xf32>
    %5 = vector.broadcast %4 : vector<8x1xf32> to vector<8x512xf32>
    %6 = arith.addf %3, %5 : vector<8x512xf32>
    %cst = arith.constant 0.000000e+00 : f32
    %7 = vector.broadcast %cst : f32 to vector<8x512xf32>
    %8 = arith.maximumf %6, %7 : vector<8x512xf32>
    %c0_5 = arith.constant 0 : index
    %c0_6 = arith.constant 0 : index
    %9 = vector.load %arg4[%c0_5, %c0_6] : memref<24x8xf32, #tpu.memory_space<vmem>>, vector<24x8xf32>
    %cst_7 = arith.constant dense<0.000000e+00> : vector<24x512xf32>
    %10 = tpu.matmul %9, %8, %cst_7 {dimension_numbers = #tpu.dot_dimension_numbers<[1], [0], [0], [1], [0, 0, 1, 1], [], []>} : vector<24x8xf32>, vector<8x512xf32>, vector<24x512xf32> -> vector<24x512xf32>
    %11 = vector.extract_strided_slice %10 {offsets = [0, 0], sizes = [8, 512], strides = [1, 1]} : vector<24x512xf32> to vector<8x512xf32>
    %cst_8 = arith.constant 0.000000e+00 : f32
    %12 = vector.broadcast %cst_8 : f32 to vector<8x512xf32>
    %13 = arith.maximumf %11, %12 : vector<8x512xf32>
    %14 = vector.extract_strided_slice %10 {offsets = [8, 0], sizes = [16, 512], strides = [1, 1]} : vector<24x512xf32> to vector<16x512xf32>
    %c4 = arith.constant 4 : index
    %c0_9 = arith.constant 0 : index
    %c0_10 = arith.constant 0 : index
    %15 = vector.load %arg5[%c4, %c0_9, %c0_10] : memref<9x8x512xf32, #tpu.memory_space<vmem>>, vector<1x8x512xf32>
    %16 = vector.shape_cast %15 : vector<1x8x512xf32> to vector<8x512xf32>
    %17 = arith.mulf %13, %16 : vector<8x512xf32>
    %c17_i32 = arith.constant 17 : i32
    %18 = tpu.dynamic_rotate %13 by %c17_i32 dim 1 : vector<8x512xf32>, i32 -> vector<8x512xf32>
    %c0_11 = arith.constant 0 : index
    %c0_12 = arith.constant 0 : index
    %c0_13 = arith.constant 0 : index
    %19 = vector.load %arg5[%c0_11, %c0_12, %c0_13] : memref<9x8x512xf32, #tpu.memory_space<vmem>>, vector<1x8x512xf32>
    %20 = vector.shape_cast %19 : vector<1x8x512xf32> to vector<8x512xf32>
    %21 = arith.mulf %18, %20 : vector<8x512xf32>
    %22 = arith.addf %17, %21 : vector<8x512xf32>
    %c16_i32 = arith.constant 16 : i32
    %23 = tpu.dynamic_rotate %13 by %c16_i32 dim 1 : vector<8x512xf32>, i32 -> vector<8x512xf32>
    %c1 = arith.constant 1 : index
    %c0_14 = arith.constant 0 : index
    %c0_15 = arith.constant 0 : index
    %24 = vector.load %arg5[%c1, %c0_14, %c0_15] : memref<9x8x512xf32, #tpu.memory_space<vmem>>, vector<1x8x512xf32>
    %25 = vector.shape_cast %24 : vector<1x8x512xf32> to vector<8x512xf32>
    %26 = arith.mulf %23, %25 : vector<8x512xf32>
    %27 = arith.addf %22, %26 : vector<8x512xf32>
    %c15_i32 = arith.constant 15 : i32
    %28 = tpu.dynamic_rotate %13 by %c15_i32 dim 1 : vector<8x512xf32>, i32 -> vector<8x512xf32>
    %c2 = arith.constant 2 : index
    %c0_16 = arith.constant 0 : index
    %c0_17 = arith.constant 0 : index
    %29 = vector.load %arg5[%c2, %c0_16, %c0_17] : memref<9x8x512xf32, #tpu.memory_space<vmem>>, vector<1x8x512xf32>
    %30 = vector.shape_cast %29 : vector<1x8x512xf32> to vector<8x512xf32>
    %31 = arith.mulf %28, %30 : vector<8x512xf32>
    %32 = arith.addf %27, %31 : vector<8x512xf32>
    %c1_i32 = arith.constant 1 : i32
    %33 = tpu.dynamic_rotate %13 by %c1_i32 dim 1 : vector<8x512xf32>, i32 -> vector<8x512xf32>
    %c3 = arith.constant 3 : index
    %c0_18 = arith.constant 0 : index
    %c0_19 = arith.constant 0 : index
    %34 = vector.load %arg5[%c3, %c0_18, %c0_19] : memref<9x8x512xf32, #tpu.memory_space<vmem>>, vector<1x8x512xf32>
    %35 = vector.shape_cast %34 : vector<1x8x512xf32> to vector<8x512xf32>
    %36 = arith.mulf %33, %35 : vector<8x512xf32>
    %37 = arith.addf %32, %36 : vector<8x512xf32>
    %c511_i32 = arith.constant 511 : i32
    %38 = tpu.dynamic_rotate %13 by %c511_i32 dim 1 : vector<8x512xf32>, i32 -> vector<8x512xf32>
    %c5 = arith.constant 5 : index
    %c0_20 = arith.constant 0 : index
    %c0_21 = arith.constant 0 : index
    %39 = vector.load %arg5[%c5, %c0_20, %c0_21] : memref<9x8x512xf32, #tpu.memory_space<vmem>>, vector<1x8x512xf32>
    %40 = vector.shape_cast %39 : vector<1x8x512xf32> to vector<8x512xf32>
    %41 = arith.mulf %38, %40 : vector<8x512xf32>
    %42 = arith.addf %37, %41 : vector<8x512xf32>
    %c497_i32 = arith.constant 497 : i32
    %43 = tpu.dynamic_rotate %13 by %c497_i32 dim 1 : vector<8x512xf32>, i32 -> vector<8x512xf32>
    %c6 = arith.constant 6 : index
    %c0_22 = arith.constant 0 : index
    %c0_23 = arith.constant 0 : index
    %44 = vector.load %arg5[%c6, %c0_22, %c0_23] : memref<9x8x512xf32, #tpu.memory_space<vmem>>, vector<1x8x512xf32>
    %45 = vector.shape_cast %44 : vector<1x8x512xf32> to vector<8x512xf32>
    %46 = arith.mulf %43, %45 : vector<8x512xf32>
    %47 = arith.addf %42, %46 : vector<8x512xf32>
    %c496_i32 = arith.constant 496 : i32
    %48 = tpu.dynamic_rotate %13 by %c496_i32 dim 1 : vector<8x512xf32>, i32 -> vector<8x512xf32>
    %c7 = arith.constant 7 : index
    %c0_24 = arith.constant 0 : index
    %c0_25 = arith.constant 0 : index
    %49 = vector.load %arg5[%c7, %c0_24, %c0_25] : memref<9x8x512xf32, #tpu.memory_space<vmem>>, vector<1x8x512xf32>
    %50 = vector.shape_cast %49 : vector<1x8x512xf32> to vector<8x512xf32>
    %51 = arith.mulf %48, %50 : vector<8x512xf32>
    %52 = arith.addf %47, %51 : vector<8x512xf32>
    %c495_i32 = arith.constant 495 : i32
    %53 = tpu.dynamic_rotate %13 by %c495_i32 dim 1 : vector<8x512xf32>, i32 -> vector<8x512xf32>
    %c8 = arith.constant 8 : index
    %c0_26 = arith.constant 0 : index
    %c0_27 = arith.constant 0 : index
    %54 = vector.load %arg5[%c8, %c0_26, %c0_27] : memref<9x8x512xf32, #tpu.memory_space<vmem>>, vector<1x8x512xf32>
    %55 = vector.shape_cast %54 : vector<1x8x512xf32> to vector<8x512xf32>
    %56 = arith.mulf %53, %55 : vector<8x512xf32>
    %57 = arith.addf %52, %56 : vector<8x512xf32>
    %c0_28 = arith.constant 0 : index
    %c0_29 = arith.constant 0 : index
    %58 = vector.load %arg6[%c0_28, %c0_29] : memref<8x1xf32, #tpu.memory_space<vmem>>, vector<8x1xf32>
    %59 = vector.broadcast %58 : vector<8x1xf32> to vector<8x512xf32>
    %60 = arith.addf %57, %59 : vector<8x512xf32>
    %cst_30 = arith.constant 0.000000e+00 : f32
    %61 = vector.broadcast %cst_30 : f32 to vector<8x512xf32>
    %62 = arith.maximumf %60, %61 : vector<8x512xf32>
    %c0_31 = arith.constant 0 : index
    %c0_32 = arith.constant 0 : index
    %63 = vector.load %arg7[%c0_31, %c0_32] : memref<16x8xf32, #tpu.memory_space<vmem>>, vector<16x8xf32>
    %cst_33 = arith.constant dense<0.000000e+00> : vector<16x512xf32>
    %64 = tpu.matmul %63, %62, %cst_33 {dimension_numbers = #tpu.dot_dimension_numbers<[1], [0], [0], [1], [0, 0, 1, 1], [], []>} : vector<16x8xf32>, vector<8x512xf32>, vector<16x512xf32> -> vector<16x512xf32>
    %65 = arith.addf %64, %14 : vector<16x512xf32>
    %c0_34 = arith.constant 0 : index
    %c0_35 = arith.constant 0 : index
    %66 = vector.load %arg8[%c0_34, %c0_35] : memref<16x512xf32, #tpu.memory_space<vmem>>, vector<16x512xf32>
    tpu.vector_store %arg8[%c0_34, %c0_35], %65 {strides = array<i32>} : memref<16x512xf32, #tpu.memory_space<vmem>>, vector<16x512xf32>,
    return
  }
  func.func @transform_0(%arg0: i32) -> (i32, i32) {
    %c0_i32 = arith.constant 0 : i32
    %c0_i32_0 = arith.constant 0 : i32
    return %c0_i32, %arg0 : i32, i32
  }
  func.func @transform_1(%arg0: i32) -> (i32, i32) {
    %c0_i32 = arith.constant 0 : i32
    %c0_i32_0 = arith.constant 0 : i32
    %c0_i32_1 = arith.constant 0 : i32
    return %c0_i32, %c0_i32_0 : i32, i32
  }
  func.func @transform_2(%arg0: i32) -> (i32, i32) {
    %c0_i32 = arith.constant 0 : i32
    %c0_i32_0 = arith.constant 0 : i32
    %c0_i32_1 = arith.constant 0 : i32
    return %c0_i32, %c0_i32_0 : i32, i32
  }
  func.func @transform_3(%arg0: i32) -> (i32, i32) {
    %c0_i32 = arith.constant 0 : i32
    %c0_i32_0 = arith.constant 0 : i32
    %c0_i32_1 = arith.constant 0 : i32
    return %c0_i32, %c0_i32_0 : i32, i32
  }
  func.func @transform_4(%arg0: i32) -> (i32, i32, i32) {
    %c0_i32 = arith.constant 0 : i32
    %c0_i32_0 = arith.constant 0 : i32
    %c0_i32_1 = arith.constant 0 : i32
    %c0_i32_2 = arith.constant 0 : i32
    return %c0_i32, %c0_i32_0, %c0_i32_1 : i32, i32, i32
  }
  func.func @transform_5(%arg0: i32) -> (i32, i32) {
    %c0_i32 = arith.constant 0 : i32
    %c0_i32_0 = arith.constant 0 : i32
    %c0_i32_1 = arith.constant 0 : i32
    return %c0_i32, %c0_i32_0 : i32, i32
  }
  func.func @transform_6(%arg0: i32) -> (i32, i32) {
    %c0_i32 = arith.constant 0 : i32
    %c0_i32_0 = arith.constant 0 : i32
    %c0_i32_1 = arith.constant 0 : i32
    return %c0_i32, %c0_i32_0 : i32, i32
  }
  func.func @transform_7(%arg0: i32) -> (i32, i32) {
    %c0_i32 = arith.constant 0 : i32
    %c0_i32_0 = arith.constant 0 : i32
    return %c0_i32, %arg0 : i32, i32
  }
}

</mosaic_0001>

<bundles_post_ra>
// kernel: tpu_custom_call.1
= control target key start
LH: loop header
LB: loop body
LE: loop exit
PB: predicated region body
PF: predicated region fallthrough
CT: control target
= control target key end

     0   :  { %s1577_s0 = inlined_call_operand.hbm [shape: f32[8,1024], index: 0, kind: input, shape index: {}]   ;;  %s1578_s1 = inlined_call_operand.vmem [shape: f32[8,1], index: 1, kind: input, shape index: {}]   ;;  %s1579_s2 = inlined_call_operand.vmem [shape: f32[8,1], index: 2, kind: input, shape index: {}]   ;;  %s1580_s3 = inlined_call_operand.vmem [shape: f32[24,8], index: 3, kind: input, shape index: {}]   ;;  %s1581_s4 = inlined_call_operand.hbm [shape: f32[9,8,512], index: 4, kind: input, shape index: {}]   ;;  %s1582_s5 = inlined_call_operand.vmem [shape: f32[8,1], index: 5, kind: input, shape index: {}]   ;;  %s1583_s6 = inlined_call_operand.vmem [shape: f32[16,8], index: 6, kind: input, shape index: {}]   ;;  %s1584_s7 = inlined_call_operand.hbm [shape: f32[16,1024], index: 7, kind: output, shape index: {}]  }
   0x1   :  { %1585 = sst [smem:[#allocation11_spill]] %s1581_s4 }
   0x2   :  { %12 = vsyncpa [#allocation3], 0 }
   0x3   :  { %14 = vsyncpa [#allocation3 + $0x1], 0 }
   0x4   :  { %15 = vsyncpa [#allocation6], 0 }
   0x5   :  { %16 = vsyncpa [#allocation4], 0 }
   0x6   :  { %18 = vsyncpa [#allocation4 + $0x1], 0  ;;  %s1201_s24 = smov 0   ;;  %s1203_s25 = smov 0  }
   0x7   :  { %s1205_s26 = smov 0   ;;  %s1207_s27 = smov 0  }
   0x8 LB: > { %s1586_s4 = sld [smem:[#allocation11_spill]]  ;;  %s1225_s8 = sadd.s32 4294967295, %s1144_s27   ;;  %s1144_s27 = sphi %s1207_s27, %s1596_s27   ;;  %s1140_s26 = sphi %s1205_s26, %s1595_s26   ;;  %s1136_s25 = sphi %s1203_s25, %s1594_s25   ;;  %s1132_s24 = sphi %s1201_s24, %s1593_s24  }
   0x9   : > { %p905_p0 = scmp.ge.s32.totalorder %s1144_s27, 1  ;;  %p45_p1 = scmp.eq.s32.totalorder %s1225_s8, 0 }
   0xa   : > { %p207_p2 = scmp.lt.s32.totalorder %s1144_s27, 3  ;;  %s1146_s10 = smov [#allocation5]  }
   0xb   : > { %s229_s11 = sshll.u32 %s1146_s10, 4  ;;  %s1147_s12 = smov 512   ;;  %s230_s11 = int_to_ptr.vmem [resolvable:$true] %s229_s11 }
   0xc   : > { %p1230_p3 = pnand %p905_p0, %p207_p2  ;;  %s1148_s13 = smov 32  }
   0xd   : > { %s904_s14 = sadd.s32 4294967294, %s1144_s27   ;;  %s1241_s15 = sadd.s32 1, %s1144_s27  }
   0xe   : > { %s227_s30 = sshll.u32 %s1586_s4, 4  ;;  %p950_p4 = pneg %p1230_p3  ;;  %s228_s30 = int_to_ptr.hbm [resolvable:$true] %s227_s30 }
   0xf   : > { %s31_s16 = sadd.s32 1, %s1140_s26  ;;  %s28_s17 = ssub.s32 %s1144_s27, %s1241_s15 }
  0x10   : > { %p951_p6 = pnand %p950_p4, %p45_p1  ;;  %p38_p7 = scmp.ne.s32.totalorder %s1140_s26, %s1136_s25 }
  0x11   : > { %p29_p8 = scmp.eq.s32.totalorder %s28_s17, 0  ;;  %p39_p9 = scmp.eq.s32.totalorder %s1144_s27, 0 }
  0x12   : > { %953 = dma.hbm_to_vmem [thread:$0]  (!%p951_p6), %s228_s30, 4608, %s230_s11, [#allocation6], %s1147_s12, %s1147_s12, %s1148_s13  }
  0x13   : > { %p44_p10 = scmp.ne.s32.totalorder %s1136_s25, %s1132_s24  ;;  %p194_p11 = scmp.eq.s32.totalorder %s1225_s8, 1 }
  0x14   : > { %s1253_s18 = scalar_select %p29_p8, %s1140_s26, %s31_s16  }
  0x15   : > { %p1257_p12 = por %p45_p1, %p44_p10  ;;  %p1261_p13 = por %p194_p11, %p38_p7 }
  0x16   : > { %p200_p0 = scmp.eq.s32.totalorder %s904_s14, 1  ;;  %p40_p2 = por %p39_p9, %p38_p7 }
  0x17   : > { %s249_s21 = sand.u32 1, %s1140_s26   ;;  %p963_p6 = scmp.lt.s32.totalorder %s1144_s27, 2 }
  0x18   : > { %p1266_p4 = por %p200_p0, %p44_p10  ;;  %s908_s23 = sshll.u32 %s249_s21, 5 }
  0x19   : > { %s940_s28 = sshll.u32 %s1144_s27, 5  ;;  %s253_s12 = scalar_lea.vmem [#allocation2], %s908_s23 }
  0x1a   : > { %s258_s10 = scalar_lea.hbm %s1577_s0, %s940_s28  ;;  %s262_s13 = sshll.u32 %s253_s12, 4  ;;  %s263_s13 = int_to_ptr.vmem [resolvable:$true] %s262_s13 }
  0x1b   : > { %s260_s11 = sshll.u32 %s258_s10, 4  ;;  %p1275_p8 = pnand %p963_p6, %p40_p2  ;;  %s261_s11 = int_to_ptr.hbm [resolvable:$true] %s260_s11 }
  0x1c   : > { %s250_s16 = scalar_lea.sflag [#allocation3], %s249_s21  ;;  %s1044_s17 = sshra.s32 %s261_s11, 4  ;;  %s1045_s17 = int_to_ptr.hbm [resolvable:$true] %s1044_s17 }
  0x1d   : > { %s1046_s4 = scalar_lea.hbm %s1045_s17, 32  ;;  %p1048_p9 = pneg %p1275_p8 }
  0x1e   : > { %p1047_p7 = scmp.ne.s32.totalorder %s1045_s17, %s1046_s4  ;;  %s1051_s23 = scalar_lea.hbm %s1577_s0, 64 }
  0x1f   : > { %p1052_p0 = scmp.lt.s32.totalorder %s1045_s17, %s1577_s0  ;;  %p1053_p2 = scmp.lt.s32.totalorder %s1051_s23, %s1046_s4 }
  0x20   : > { %p1049_p10 = pnand %p1048_p9, %p1047_p7 }
  0x21   : > { %p1054_p6 = por %p1053_p2, %p1052_p0 }
  0x22   : > { %p1050_p11 = pneg %p1049_p10 }
  0x24   : > { %p1055_p5 = pnand %p1054_p6, %p1050_p11 }
  0x26   : > { %1058 = shalt.err (!%p1055_p5)
}
  0x27   : > { %957 = dma.hbm_to_vmem [thread:$0]  (!%p1275_p8), %s261_s11, 512, %s263_s13, %s250_s16  }
  0x28   : > { %271 = sbr.rel (%p1230_p3) target bundleno = 664 (0x298), region = 48  ;;  %s1292_s21 = sand.u32 (!%p1230_p3), 1, %s1136_s25  }
  0x29   : > { %s912_s12 = sshll.u32 (!%p1230_p3), %s1292_s21, 5  ;;  %s274_s28 = scalar_lea.sflag (!%p1230_p3), [#allocation3], %s1292_s21 }
  0x2a   : > { %s277_s29 = scalar_lea.vmem (!%p1230_p3), [#allocation2], %s912_s12 }
  0x2d   : > { %1119 = dma.done.wait (%p1257_p12), %s274_s28, 512  }
  0x2e   : > { %1121 = vsyncadd (%p1257_p12), %s274_s28, 4294966784 }
  0x2f   : > { %1123 = dma.done.wait (%p45_p1), [#allocation6], 4608  }
  0x30   : > { %1125 = vsyncadd (%p45_p1), [#allocation6], 4294962688  ;;  %v1149_v0 = vmov 0   ;;  %v320_v1 = vld [vmem:[%s1578_s1] sm:$0xff]  ;;  %v317_v5 = vld [vmem:[%s277_s29 + $0x8] sm:$0xff]  ;;  %vm347_vm0 = vcmask 64512   ;;  %v482_v33 = vlaneseq }
  0x31   : > { %1013 = vset.pattern.permute.xlu0 %v1149_v0  ;;  %v330_v2 = vld [vmem:[%s1579_s2] sm:$0xff]  ;;  %v318_v6 = vld [vmem:[%s277_s29 + $0x10] sm:$0xff]  ;;  %v319_v7 = vld [vmem:[%s277_s29 + $0x18] sm:$0xff]  ;;  %s1150_s16 = smov 1   ;;  %s1151_s17 = smov 16  }
  0x32   : > { %323 = vperm.xlu0 %1013, %v320_v1   ;;  %v316_v4 = vld [vmem:[%s277_s29] sm:$0xff]  ;;  %s1152_s23 = smov 17   ;;  %s1153_s30 = smov 15   ;;  %v1376_v35 = vand.u32 127, %v482_v33  ;;  %v490_v38 = vld [vmem:[#allocation5 + $0x8] sm:$0xff] }
  0x33   : > { %v344_v21 = vld [vmem:[%s1580_s3] sm:$0xff]  ;;  %s1154_s10 = smov 127   ;;  %s1155_s12 = smov 112   ;;  %v467_v40 = vld [vmem:[#allocation5 + $0x88] sm:$0xff] }
  0x34   : > { %s1156_s28 = smov 113   ;;  %s1157_s29 = smov 111   ;;  %v683_v30 = vld [vmem:[%s1582_s5] sm:$0xff]  ;;  %vm484_vm1 = vcmp.lt.s32.totalorder %v1376_v35, 17  ;;  %vm509_vm2 = vcmp.lt.s32.totalorder %v1376_v35, 16  ;;  %v516_v43 = vld [vmem:[#allocation5 + $0x28] sm:$0xff] }
  0x35   : > { %vm561_vm3 = vcmp.lt.s32.totalorder %v1376_v35, 1  ;;  %vm535_vm4 = vcmp.lt.s32.totalorder %v1376_v35, 15  ;;  %v542_v52 = vld [vmem:[#allocation5 + $0x48] sm:$0xff]  ;;  %vm587_vm5 = vcmp.lt.s32.totalorder %v1376_v35, 127  ;;  %vm639_vm6 = vcmp.lt.s32.totalorder %v1376_v35, 112 }
  0x36   : > { %v568_v55 = vld [vmem:[#allocation5 + $0x68] sm:$0xff]  ;;  %vm613_vm7 = vcmp.lt.s32.totalorder %v1376_v35, 113  ;;  %vm665_vm8 = vcmp.lt.s32.totalorder %v1376_v35, 111 }
  0x3a   : > { %333 = vperm.xlu0 %1013, %v330_v2  }
  0xa4   : > { %v324_v3 = vpop.permute.xlu0 %323 }
  0xa5   : > { %v326_v8 = vmul.f32 %v324_v3, %v316_v4  ;;  %v327_v9 = vmul.f32 %v324_v3, %v317_v5  ;;  %v328_v10 = vmul.f32 %v324_v3, %v318_v6  ;;  %v329_v11 = vmul.f32 %v324_v3, %v319_v7  ;;  %v345_v3 = vld [vmem:[%s1580_s3 + $0x8] sm:$0xff]  ;;  %v468_v4 = vld [vmem:[#allocation5 + $0x90] sm:$0xff] }
  0xa6   : > { %v491_v5 = vld [vmem:[#allocation5 + $0x10] sm:$0xff] }
  0xac   : > { %v334_v12 = vpop.permute.xlu0 %333 }
  0xad   : > { %v336_v13 = vadd.f32 %v334_v12, %v326_v8  ;;  %v337_v14 = vadd.f32 %v334_v12, %v327_v9  ;;  %v338_v15 = vadd.f32 %v334_v12, %v328_v10  ;;  %v339_v16 = vadd.f32 %v334_v12, %v329_v11  ;;  %v517_v8 = vld [vmem:[#allocation5 + $0x30] sm:$0xff] }
  0xaf   : > { %v340_v17 = vmax.f32 %v336_v13, 0.0  ;;  %v341_v18 = vmax.f32 %v337_v14, 0.0  ;;  %v342_v19 = vmax.f32 %v338_v15, 0.0  ;;  %v343_v20 = vmax.f32 %v339_v16, 0.0 }
  0xb1   : > { %372 = vmatpush.msra.mxu0 %v340_v17  ;;  %398 = vmatpush.msra.mxu1 %v341_v18  ;;  %v346_v17 = vld [vmem:[%s1580_s3 + $0x10] sm:$0xff] }
  0xb2   : > { %424 = vmatpush.msra.mxu2 %v342_v19  ;;  %450 = vmatpush.msra.mxu3 %v343_v20  ;;  %v489_v19 = vld [vmem:[#allocation5] sm:$0xff] }
  0xb3   : > { %918 = vmatmul.msk.f32.vlgmr.msra.gmra.mxu1 %vm347_vm0, %v344_v21  ;;  %915 = vmatmul.msk.f32.vlgmr.msra.gmra.mxu0 %vm347_vm0, %v344_v21 }
  0xb4   : > { %921 = vmatmul.msk.f32.vlgmr.msra.gmra.mxu2 %vm347_vm0, %v344_v21  ;;  %924 = vmatmul.msk.f32.vlgmr.msra.gmra.mxu3 %vm347_vm0, %v344_v21 }
  0xbb   : > { %916 = vmatmul.msk.f32.gmra.mxu0 %vm347_vm0, %v345_v3  ;;  %919 = vmatmul.msk.f32.gmra.mxu1 %vm347_vm0, %v345_v3 }
  0xbc   : > { %922 = vmatmul.msk.f32.gmra.mxu2 %vm347_vm0, %v345_v3  ;;  %925 = vmatmul.msk.f32.gmra.mxu3 %vm347_vm0, %v345_v3 }
  0xc3   : > { %917 = vmatmul.msk.f32.gmra.mxu0 %vm347_vm0, %v346_v17  ;;  %920 = vmatmul.msk.f32.gmra.mxu1 %vm347_vm0, %v346_v17 }
  0xc4   : > { %923 = vmatmul.msk.f32.gmra.mxu2 %vm347_vm0, %v346_v17  ;;  %926 = vmatmul.msk.f32.gmra.mxu3 %vm347_vm0, %v346_v17 }
 0x130   : > { %v400_v22 = vpop.f32.mrf.mxu1  ;;  %v374_v24 = vpop.f32.mrf.mxu0 }
 0x131   : > { %v1317_v23 = vmax.f32 %v400_v22, 0.0  ;;  %v1324_v25 = vmax.f32 %v374_v24, 0.0  ;;  %v466_v22 = vld [vmem:[#allocation5 + $0x80] sm:$0xff] }
 0x133   : > { %555 = vrot.lane.b32.xlu0 %v1317_v23, %s1150_s16  ;;  %503 = vrot.lane.b32.xlu2 %v1317_v23, %s1151_s17  ;;  %v471_v44 = vmul.f32 %v467_v40, %v1317_v23 }
 0x134   : > { %476 = vrot.lane.b32.xlu1 %v1317_v23, %s1152_s23 }
 0x137   : > { %v426_v26 = vpop.f32.mrf.mxu2  ;;  %v452_v28 = vpop.f32.mrf.mxu3 }
 0x138   : > { %v1337_v27 = vmax.f32 %v426_v26, 0.0  ;;  %v1344_v29 = vmax.f32 %v452_v28, 0.0  ;;  %v470_v28 = vmul.f32 %v466_v22, %v1324_v25 }
 0x13a   : > { %v472_v12 = vmul.f32 %v468_v4, %v1337_v27  ;;  %v569_v4 = vld [vmem:[#allocation5 + $0x70] sm:$0xff] }
 0x13b   : > { %529 = vrot.lane.b32.xlu2 %v1317_v23, %s1153_s30  ;;  %501 = vrot.lane.b32.xlu0 %v1324_v25, %s1151_s17 }
 0x13c   : > { %579 = vrot.lane.b32.xlu1 %v1324_v25, %s1154_s10 }
 0x143   : > { %631 = vrot.lane.b32.xlu0 %v1324_v25, %s1155_s12  ;;  %474 = vrot.lane.b32.xlu2 %v1324_v25, %s1152_s23 }
 0x144   : > { %527 = vrot.lane.b32.xlu1 %v1324_v25, %s1153_s30 }
 0x14b   : > { %581 = vrot.lane.b32.xlu0 %v1317_v23, %s1154_s10  ;;  %605 = vrot.lane.b32.xlu2 %v1324_v25, %s1156_s28 }
 0x14c   : > { %657 = vrot.lane.b32.xlu1 %v1324_v25, %s1157_s29 }
 0x153   : > { %505 = vrot.lane.b32.xlu0 %v1337_v27, %s1151_s17  ;;  %553 = vrot.lane.b32.xlu2 %v1324_v25, %s1150_s16 }
 0x154   : > { %607 = vrot.lane.b32.xlu1 %v1317_v23, %s1156_s28 }
 0x15b   : > { %531 = vrot.lane.b32.xlu0 %v1337_v27, %s1153_s30  ;;  %480 = vrot.lane.b32.xlu2 %v1344_v29, %s1152_s23 }
 0x15c   : > { %478 = vrot.lane.b32.xlu1 %v1337_v27, %s1152_s23  ;;  %s1094_s23 = scalar_lea.hbm %s1584_s7, 128 }
 0x163   : > { %585 = vrot.lane.b32.xlu0 %v1344_v29, %s1154_s10  ;;  %559 = vrot.lane.b32.xlu2 %v1344_v29, %s1150_s16 }
 0x164   : > { %507 = vrot.lane.b32.xlu1 %v1344_v29, %s1151_s17 }
 0x16b   : > { %609 = vrot.lane.b32.xlu0 %v1337_v27, %s1156_s28  ;;  %583 = vrot.lane.b32.xlu2 %v1337_v27, %s1154_s10  ;;  %s914_s10 = sshll.u32 %s1292_s21, 6 }
 0x16c   : > { %533 = vrot.lane.b32.xlu1 %v1344_v29, %s1153_s30 }
 0x173   : > { %663 = vrot.lane.b32.xlu0 %v1344_v29, %s1157_s29  ;;  %637 = vrot.lane.b32.xlu2 %v1344_v29, %s1155_s12 }
 0x174   : > { %557 = vrot.lane.b32.xlu1 %v1337_v27, %s1150_s16 }
 0x17b   : > { %686 = vperm.xlu0 %1013, %v683_v30   ;;  %661 = vrot.lane.b32.xlu2 %v1337_v27, %s1157_s29 }
 0x17c   : > { %611 = vrot.lane.b32.xlu1 %v1344_v29, %s1156_s28  ;;  %s941_s28 = sshll.u32 %s1225_s8, 5  ;;  %s806_s8 = scalar_lea.sflag [#allocation4], %s1292_s21 }
 0x17d   : > { %s817_s9 = scalar_lea.hbm %s1584_s7, %s941_s28 }
 0x17e   : > { %s820_s13 = sshll.u32 %s817_s9, 4  ;;  %s821_s13 = int_to_ptr.hbm [resolvable:$true] %s820_s13 }
 0x17f   : > { %s1088_s19 = sshra.s32 %s821_s13, 4  ;;  %s1089_s19 = int_to_ptr.hbm [resolvable:$true] %s1088_s19 }
 0x180   : > { %s1090_s14 = scalar_lea.hbm %s1089_s19, 64  ;;  %p1095_p12 = scmp.lt.s32.totalorder %s1089_s19, %s1584_s7 }
 0x181   : > { %p1091_p1 = scmp.ne.s32.totalorder %s1089_s19, %s1090_s14  ;;  %p1096_p8 = scmp.lt.s32.totalorder %s1094_s23, %s1090_s14 }
 0x183   : > { %633 = vrot.lane.b32.xlu2 %v1317_v23, %s1155_s12  ;;  %p1092_p3 = pnand %p1091_p1, %p1261_p13  ;;  %p1097_p7 = por %p1096_p8, %p1095_p12 }
 0x184   : > { %635 = vrot.lane.b32.xlu1 %v1337_v27, %s1155_s12  ;;  %s313_s12 = scalar_lea.vmem [#allocation7], %s914_s10 }
 0x185   : > { %s818_s11 = sshll.u32 %s313_s12, 4  ;;  %p1093_p5 = pneg %p1092_p3  ;;  %s1545_s11 = int_to_ptr.vmem [resolvable:$true] %s818_s11 }
 0x187   : > { %p1098_p9 = pnand %p1097_p7, %p1093_p5 }
 0x18c   : > { %659 = vrot.lane.b32.xlu1 %v1317_v23, %s1157_s29  ;;  %v515_v23 = vld [vmem:[#allocation5 + $0x20] sm:$0xff] }
 0x18d   : > { %v504_v31 = vpop.permute.xlu2 %503 }
 0x195   : > { %v1372_v32 = vpop.permute.xlu2 %529 }
 0x19d   : > { %v1374_v34 = vpop.permute.xlu2 %474 }
 0x1a5   : > { %v1378_v36 = vpop.permute.xlu0 %555  ;;  %v1384_v41 = vpop.permute.xlu2 %605 }
 0x1a6   : > { %v477_v37 = vpop.permute.xlu1 %476 }
 0x1a7   : > { %v487_v39 = vsel %vm484_vm1, %v1374_v34, %v477_v37 }
 0x1a8   : > { %v494_v42 = vmul.f32 %v490_v38, %v487_v39  ;;  %v567_v38 = vld [vmem:[#allocation5 + $0x60] sm:$0xff]  ;;  %v492_v39 = vld [vmem:[#allocation5 + $0x18] sm:$0xff] }
 0x1aa   : > { %v498_v48 = vadd.f32 %v494_v42, %v471_v44  ;;  %v593_v44 = vld [vmem:[#allocation5 + $0xa0] sm:$0xff] }
 0x1ad   : > { %v502_v45 = vpop.permute.xlu0 %501  ;;  %v554_v51 = vpop.permute.xlu2 %553 }
 0x1ae   : > { %v1388_v46 = vpop.permute.xlu1 %579  ;;  %v512_v47 = vsel %vm509_vm2, %v502_v45, %v504_v31  ;;  %v564_v56 = vsel %vm561_vm3, %v554_v51, %v1378_v36 }
 0x1af   : > { %v520_v49 = vmul.f32 %v516_v43, %v512_v47  ;;  %v572_v59 = vmul.f32 %v568_v55, %v564_v56  ;;  %v469_v47 = vld [vmem:[#allocation5 + $0x98] sm:$0xff]  ;;  %v543_v56 = vld [vmem:[#allocation5 + $0x50] sm:$0xff] }
 0x1b1   : > { %v524_v50 = vadd.f32 %v520_v49, %v498_v48  ;;  %v518_v48 = vld [vmem:[#allocation5 + $0x38] sm:$0xff] }
 0x1b5   : > { %v1394_v53 = vpop.permute.xlu0 %631  ;;  %v481_v0 = vpop.permute.xlu2 %480 }
 0x1b6   : > { %v528_v54 = vpop.permute.xlu1 %527  ;;  %v488_v20 = vsel %vm484_vm1, %v481_v0, %v1374_v34 }
 0x1b7   : > { %v538_v57 = vsel %vm535_vm4, %v528_v54, %v1372_v32  ;;  %v493_v27 = vmul.f32 %v489_v19, %v488_v20  ;;  %v596_v19 = vld [vmem:[#allocation5 + $0xb8] sm:$0xff] }
 0x1b8   : > { %v546_v58 = vmul.f32 %v542_v52, %v538_v57  ;;  %v544_v57 = vld [vmem:[#allocation5 + $0x58] sm:$0xff] }
 0x1b9   : > { %v497_v33 = vadd.f32 %v493_v27, %v470_v28  ;;  %v648_v27 = vld [vmem:[#allocation5 + $0xf8] sm:$0xff] }
 0x1ba   : > { %v550_v60 = vadd.f32 %v546_v58, %v524_v50 }
 0x1bc   : > { %v1402_v61 = vadd.f32 %v572_v59, %v550_v60 }
 0x1bd   : > { %v1404_v62 = vpop.permute.xlu0 %581  ;;  %v1415_v6 = vpop.permute.xlu2 %559 }
 0x1be   : > { %v1406_v63 = vpop.permute.xlu1 %657  ;;  %v565_v34 = vsel %vm561_vm3, %v1415_v6, %v554_v51 }
 0x1bf   : > { %v571_v50 = vmul.f32 %v567_v38, %v565_v34  ;;  %v674_v38 = vld [vmem:[#allocation5 + $0x118] sm:$0xff] }
 0x1c5   : > { %v506_v1 = vpop.permute.xlu0 %505  ;;  %v1434_v21 = vpop.permute.xlu2 %583 }
 0x1c6   : > { %v1408_v2 = vpop.permute.xlu1 %607  ;;  %v511_v9 = vsel %vm509_vm2, %v504_v31, %v506_v1  ;;  %v541_v31 = vld [vmem:[#allocation5 + $0x40] sm:$0xff] }
 0x1c7   : > { %v521_v14 = vmul.f32 %v517_v8, %v511_v9 }
 0x1cd   : > { %v532_v11 = vpop.permute.xlu0 %531  ;;  %v1455_v52 = vpop.permute.xlu2 %637 }
 0x1ce   : > { %v479_v7 = vpop.permute.xlu1 %478  ;;  %v643_v28 = vsel %vm639_vm6, %v1455_v52, %v1394_v53 }
 0x1cf   : > { %v486_v10 = vsel %vm484_vm1, %v477_v37, %v479_v7  ;;  %v485_v40 = vsel %vm484_vm1, %v479_v7, %v481_v0  ;;  %v473_v0 = vmul.f32 %v469_v47, %v1344_v29 }
 0x1d0   : > { %v495_v13 = vmul.f32 %v491_v5, %v486_v10  ;;  %v496_v51 = vmul.f32 %v492_v39, %v485_v40  ;;  %v570_v5 = vld [vmem:[#allocation5 + $0x78] sm:$0xff]  ;;  %v621_v39 = vld [vmem:[#allocation5 + $0xd0] sm:$0xff] }
 0x1d2   : > { %v499_v15 = vadd.f32 %v495_v13, %v472_v12  ;;  %v500_v7 = vadd.f32 %v496_v51, %v473_v0  ;;  %v616_v51 = vsel %vm613_vm7, %v1384_v41, %v1408_v2  ;;  %v673_v0 = vld [vmem:[#allocation5 + $0x110] sm:$0xff] }
 0x1d4   : > { %v525_v16 = vadd.f32 %v521_v14, %v499_v15 }
 0x1d5   : > { %v1438_v26 = vpop.permute.xlu0 %585  ;;  %v1476_v22 = vpop.permute.xlu2 %661 }
 0x1d6   : > { %v508_v18 = vpop.permute.xlu1 %507  ;;  %v591_v20 = vsel %vm587_vm5, %v1438_v26, %v1388_v46 }
 0x1d7   : > { %v513_v24 = vsel %vm509_vm2, %v508_v18, %v502_v45  ;;  %v590_v45 = vsel %vm587_vm5, %v1388_v46, %v1404_v62  ;;  %v510_v49 = vsel %vm509_vm2, %v506_v1, %v508_v18 }
 0x1d8   : > { %v519_v30 = vmul.f32 %v515_v23, %v513_v24  ;;  %v597_v60 = vmul.f32 %v593_v44, %v590_v45  ;;  %v522_v3 = vmul.f32 %v518_v48, %v510_v49  ;;  %v622_v24 = vld [vmem:[#allocation5 + $0xd8] sm:$0xff]  ;;  %v594_v48 = vld [vmem:[#allocation5 + $0xa8] sm:$0xff]  ;;  %v647_v49 = vld [vmem:[#allocation5 + $0xf0] sm:$0xff] }
 0x1da   : > { %v523_v43 = vadd.f32 %v519_v30, %v497_v33  ;;  %v526_v29 = vadd.f32 %v522_v3, %v500_v7  ;;  %v595_v33 = vld [vmem:[#allocation5 + $0xb0] sm:$0xff] }
 0x1dd   : > { %v610_v59 = vpop.permute.xlu0 %609 }
 0x1de   : > { %v534_v37 = vpop.permute.xlu1 %533 }
 0x1df   : > { %v539_v42 = vsel %vm535_vm4, %v534_v37, %v528_v54  ;;  %v537_v54 = vsel %vm535_vm4, %v1372_v32, %v532_v11  ;;  %v536_v58 = vsel %vm535_vm4, %v532_v11, %v534_v37  ;;  %v588_v37 = vsel %vm587_vm5, %v1434_v21, %v1438_v26 }
 0x1e0   : > { %v545_v25 = vmul.f32 %v541_v31, %v539_v42  ;;  %v547_v8 = vmul.f32 %v543_v56, %v537_v54  ;;  %v548_v9 = vmul.f32 %v544_v57, %v536_v58  ;;  %v652_v42 = vmul.f32 %v648_v27, %v643_v28  ;;  %v620_v58 = vld [vmem:[#allocation5 + $0xc8] sm:$0xff] }
 0x1e1   : > { %v589_v26 = vsel %vm587_vm5, %v1404_v62, %v1434_v21 }
 0x1e2   : > { %v549_v55 = vadd.f32 %v545_v25, %v523_v43  ;;  %v551_v13 = vadd.f32 %v547_v8, %v525_v16  ;;  %v552_v17 = vadd.f32 %v548_v9, %v526_v29  ;;  %v599_v25 = vmul.f32 %v595_v33, %v588_v37 }
 0x1e4   : > { %v575_v1 = vadd.f32 %v571_v50, %v549_v55  ;;  %v619_v50 = vld [vmem:[#allocation5 + $0xc0] sm:$0xff]  ;;  %v634_v55 = vpop.permute.xlu2 %633 }
 0x1e5   : > { %v664_v23 = vpop.permute.xlu0 %663  ;;  %v623_v7 = vmul.f32 %v619_v50, %v616_v51  ;;  %v642_v8 = vsel %vm639_vm6, %v1394_v53, %v634_v55 }
 0x1e6   : > { %v1463_v10 = vadd.f32 %v597_v60, %v575_v1  ;;  %v558_v12 = vpop.permute.xlu1 %557  ;;  %v669_v34 = vsel %vm665_vm8, %v664_v23, %v1406_v63  ;;  %v615_v60 = vsel %vm613_vm7, %v1408_v2, %v610_v59  ;;  %v666_v62 = vsel %vm665_vm8, %v1476_v22, %v664_v23  ;;  %v646_v2 = vld [vmem:[#allocation5 + $0xe8] sm:$0xff] }
 0x1e7   : > { %v562_v32 = vsel %vm561_vm3, %v558_v12, %v1415_v6  ;;  %v563_v11 = vsel %vm561_vm3, %v1378_v36, %v558_v12  ;;  %v600_v36 = vmul.f32 %v596_v19, %v591_v20  ;;  %v678_v44 = vmul.f32 %v674_v38, %v669_v34  ;;  %v645_v12 = vld [vmem:[#allocation5 + $0xe0] sm:$0xff]  ;;  %v672_v19 = vld [vmem:[#allocation5 + $0x108] sm:$0xff]  ;;  %v377_v38 = vpop.f32.mrf.mxu0  ;;  %v403_v34 = vpop.f32.mrf.mxu1 }
 0x1e8   : > { %v573_v14 = vmul.f32 %v569_v4, %v563_v11  ;;  %v574_v15 = vmul.f32 %v570_v5, %v562_v32  ;;  %v624_v9 = vmul.f32 %v620_v58, %v615_v60  ;;  %v677_v32 = vmul.f32 %v673_v0, %v666_v62 }
 0x1e9   : > { %v627_v29 = vadd.f32 %v623_v7, %v1463_v10 }
 0x1ea   : > { %v577_v18 = vadd.f32 %v573_v14, %v551_v13  ;;  %v578_v6 = vadd.f32 %v574_v15, %v552_v17  ;;  %v649_v17 = vmul.f32 %v645_v12, %v642_v8 }
 0x1ec   : > { %v604_v30 = vadd.f32 %v600_v36, %v578_v6  ;;  %v603_v56 = vadd.f32 %v599_v25, %v577_v18  ;;  %v671_v18 = vld [vmem:[#allocation5 + $0x100] sm:$0xff] }
 0x1ed   : > { %v687_v21 = vpop.permute.xlu0 %686 }
 0x1ee   : > { %v612_v16 = vpop.permute.xlu1 %611 }
 0x1ef   : > { %v617_v46 = vsel %vm613_vm7, %v612_v16, %v1384_v41  ;;  %v614_v40 = vsel %vm613_vm7, %v610_v59, %v612_v16  ;;  %v598_v41 = vmul.f32 %v594_v48, %v589_v26 }
 0x1f0   : > { %v626_v31 = vmul.f32 %v622_v24, %v617_v46  ;;  %v625_v45 = vmul.f32 %v621_v39, %v614_v40  ;;  %v653_v24 = vadd.f32 %v649_v17, %v627_v29  ;;  %v429_v39 = vpop.f32.mrf.mxu2 }
 0x1f1   : > { %v602_v14 = vadd.f32 %v598_v41, %v1402_v61 }
 0x1f2   : > { %v630_v43 = vadd.f32 %v626_v31, %v604_v30  ;;  %v629_v1 = vadd.f32 %v625_v45, %v603_v56  ;;  %v698_v31 = vld [vmem:[%s1583_s6 + $0x8] sm:$0xff] }
 0x1f3   : > { %v628_v20 = vadd.f32 %v624_v9, %v602_v14 }
 0x1f4   : > { %v656_v47 = vadd.f32 %v652_v42, %v630_v43  ;;  %v380_v42 = vpop.f32.mrf.mxu0  ;;  %v406_v43 = vpop.f32.mrf.mxu1 }
 0x1f6   : > { %v636_v54 = vpop.permute.xlu1 %635  ;;  %v682_v57 = vadd.f32 %v678_v44, %v656_v47 }
 0x1f7   : > { %v640_v3 = vsel %vm639_vm6, %v636_v54, %v1455_v52  ;;  %v641_v59 = vsel %vm639_vm6, %v634_v55, %v636_v54  ;;  %v697_v52 = vld [vmem:[%s1583_s6] sm:$0xff] }
 0x1f8   : > { %v651_v4 = vmul.f32 %v647_v49, %v640_v3  ;;  %v692_v5 = vadd.f32 %v687_v21, %v682_v57  ;;  %v650_v15 = vmul.f32 %v646_v2, %v641_v59  ;;  %v432_v25 = vpop.f32.mrf.mxu2 }
 0x1fa   : > { %v655_v11 = vadd.f32 %v651_v4, %v629_v1  ;;  %v696_v13 = vmax.f32 %v692_v5, 0.0  ;;  %v654_v10 = vadd.f32 %v650_v15, %v628_v20 }
 0x1fc   : > { %789 = vmatpush.msrb.mxu3 %v696_v13  ;;  %v681_v53 = vadd.f32 %v677_v32, %v655_v11 }
 0x1fd   : > { %933 = vmatmul.msk.f32.vlgmr.msrb.gmra.mxu3 %vm347_vm0, %v697_v52 }
 0x1fe   : > { %v660_v6 = vpop.permute.xlu1 %659  ;;  %v691_v23 = vadd.f32 %v687_v21, %v681_v53 }
 0x1ff   : > { %v667_v36 = vsel %vm665_vm8, %v660_v6, %v1476_v22  ;;  %v668_v61 = vsel %vm665_vm8, %v1406_v63, %v660_v6  ;;  %v455_v63 = vpop.f32.mrf.mxu3 }
 0x200   : > { %v675_v16 = vmul.f32 %v671_v18, %v668_v61  ;;  %v676_v27 = vmul.f32 %v672_v19, %v667_v36  ;;  %v695_v28 = vmax.f32 %v691_v23, 0.0 }
 0x202   : > { %766 = vmatpush.msrb.mxu2 %v695_v28  ;;  %v679_v46 = vadd.f32 %v675_v16, %v653_v24  ;;  %v680_v30 = vadd.f32 %v676_v27, %v654_v10 }
 0x203   : > { %931 = vmatmul.msk.f32.vlgmr.msrb.gmra.mxu2 %vm347_vm0, %v697_v52 }
 0x204   : > { %v689_v33 = vadd.f32 %v687_v21, %v679_v46  ;;  %v690_v37 = vadd.f32 %v687_v21, %v680_v30 }
 0x205   : > { %934 = vmatmul.msk.f32.gmra.mxu3 %vm347_vm0, %v698_v31 }
 0x206   : > { %v693_v22 = vmax.f32 %v689_v33, 0.0  ;;  %v694_v35 = vmax.f32 %v690_v37, 0.0 }
 0x207   : > { %v458_v40 = vpop.f32.mrf.mxu3 }
 0x208   : > { %720 = vmatpush.msrb.mxu0 %v693_v22  ;;  %743 = vmatpush.msrb.mxu1 %v694_v35 }
 0x209   : > { %927 = vmatmul.msk.f32.vlgmr.msrb.gmra.mxu0 %vm347_vm0, %v697_v52  ;;  %929 = vmatmul.msk.f32.vlgmr.msrb.gmra.mxu1 %vm347_vm0, %v697_v52 }
 0x20b   : > { %932 = vmatmul.msk.f32.gmra.mxu2 %vm347_vm0, %v698_v31 }
 0x211   : > { %928 = vmatmul.msk.f32.gmra.mxu0 %vm347_vm0, %v698_v31  ;;  %930 = vmatmul.msk.f32.gmra.mxu1 %vm347_vm0, %v698_v31 }
 0x280   : > { %v791_v44 = vpop.f32.mrf.mxu3 }
 0x281   : > { %v792_v45 = vadd.f32 %v791_v44, %v455_v63 }
 0x283   : > { %800 = vst [vmem:[%s313_s12 + $0x18] sm:$0xff] %v792_v45 }
 0x286   : > { %v722_v47 = vpop.f32.mrf.mxu0  ;;  %v745_v48 = vpop.f32.mrf.mxu1 }
 0x287   : > { %v723_v26 = vadd.f32 %v722_v47, %v377_v38  ;;  %v746_v49 = vadd.f32 %v745_v48, %v403_v34  ;;  %v768_v50 = vpop.f32.mrf.mxu2 }
 0x288   : > { %v769_v51 = vadd.f32 %v768_v50, %v429_v39  ;;  %v794_v55 = vpop.f32.mrf.mxu3 }
 0x289   : > { %797 = vst [vmem:[%s313_s12] sm:$0xff] %v723_v26  ;;  %v795_v56 = vadd.f32 %v794_v55, %v458_v40 }
 0x28a   : > { %798 = vst [vmem:[%s313_s12 + $0x8] sm:$0xff] %v746_v49 }
 0x28b   : > { %799 = vst [vmem:[%s313_s12 + $0x10] sm:$0xff] %v769_v51 }
 0x28c   : > { %804 = vst [vmem:[%s313_s12 + $0x38] sm:$0xff] %v795_v56 }
 0x28e   : > { %v725_v54 = vpop.f32.mrf.mxu0  ;;  %v748_v57 = vpop.f32.mrf.mxu1 }
 0x28f   : > { %v726_v58 = vadd.f32 %v725_v54, %v380_v42  ;;  %v749_v60 = vadd.f32 %v748_v57, %v406_v43  ;;  %v771_v0 = vpop.f32.mrf.mxu2 }
 0x290   : > { %v772_v62 = vadd.f32 %v771_v0, %v432_v25 }
 0x291   : > { %801 = vst [vmem:[%s313_s12 + $0x20] sm:$0xff] %v726_v58 }
 0x292   : > { %802 = vst [vmem:[%s313_s12 + $0x28] sm:$0xff] %v749_v60 }
 0x293   : > { %803 = vst [vmem:[%s313_s12 + $0x30] sm:$0xff] %v772_v62 }
 0x294   : > { %1101 = shalt.err (!%p1098_p9)
}
 0x295   : > { %s1158_s21 = smov 512   ;;  %s1159_s12 = smov 1024  }
 0x296   : > { %s1160_s28 = smov 32  }
 0x297   : > { %948 = dma.vmem_to_hbm [thread:$0]  (%p1261_p13), %s1545_s11, 1024, %s821_s13, %s806_s8, %s1158_s21, %s1159_s12, %s1160_s28  }
 0x298 PF: > { %s835_s29 = sand.u32 1, %s1132_s24   ;;  %p1592_p10 = scmp.ge.s32.totalorder %s1144_s27, 2 }
 0x299   : > { %s836_s4 = scalar_lea.sflag [#allocation4], %s835_s29 }
 0x29a   : > { %p959_p11 = pnand %p1592_p10, %p1266_p4 }
 0x29c   : > { %p960_p0 = pneg %p959_p11 }
 0x29e   : > { %1127 = dma.done.wait (%p960_p0), %s836_s4, 1024  }
 0x29f   : > { %1129 = vsyncadd (%p960_p0), %s836_s4, 4294966272  ;;  %p21_p2 = scmp.ge.s32.totalorder %s1241_s15, 4   ;;  %s1593_s24 = smov %s1136_s25 }
 0x2a0   : > { %s1594_s25 = smov %s1140_s26  ;;  %s1595_s26 = smov %s1253_s18 }
 0x2a1   : > { %s1596_s27 = smov %s1241_s15  ;;  %23 = sbr.rel (!%p21_p2) target bundleno = 8 (0x8), region = 105 }
 0x2a6   :  { %842 = vsyncpa [#allocation3], 1 }
 0x2a7   :  { %844 = vsyncpa [#allocation3 + $0x1], 1 }
 0x2a8   :  { %845 = vsyncpa [#allocation6], 1 }
 0x2a9   :  { %846 = vsyncpa [#allocation4], 1 }
 0x2aa   :  { %848 = vsyncpa [#allocation4 + $0x1], 1 }

</bundles_post_ra>
